<compile_context>
chip_gen: v7x
topology: tpu7x:2x2x1
jax: 0.10.0
libtpu: 0.0.40
codegen_flags: <defaults>
</compile_context>

<pallas_src>
import functools

import jax
import jax.numpy as jnp
from jax.experimental import pallas as pl
from jax.experimental.pallas import tpu as pltpu

_LANE = 128
_SUBLANE = 8
_F32_BYTES = 4
_MIN_GRID_POINTS = 8   # enough parallel points for megacore sharding (v7x) + pipelining


def _vmem_capacity_bytes():
    """Best-effort physical VMEM query; None if unavailable."""
    try:
        info = pltpu.get_tpu_info()
    except Exception:
        return None
    for name in ("vmem_capacity_bytes", "vmem_size_bytes", "vmem_bytes"):
        v = getattr(info, name, None)
        try:
            v = int(v)
        except (TypeError, ValueError):
            continue
        if v > 0:
            return v
    return None


def _budgets():
    """(x-tile f32 budget bytes, scoped vmem_limit_bytes), generation-aware.

    Live set is roughly 5-6x the x tile (double-buffered in + out + f32 temps), so:
      * 128 MiB VMEM parts (v5e/v6e): ~6 MiB tile, 64 MiB scoped limit.
      * 64 MiB parts (v7x) or unknown: ~4 MiB tile, 48 MiB scoped limit (safe everywhere).
    """
    cap = _vmem_capacity_bytes()
    if cap is not None and cap > 64 * 1024 * 1024:
        return 6 * 1024 * 1024, 64 * 1024 * 1024
    return 4 * 1024 * 1024, 48 * 1024 * 1024


def _channel_tile_candidates(C):
    """Multiple-of-128 divisors of C (descending), else full C."""
    if C % _LANE == 0:
        cands = [c for c in (512, 384, 256, 128) if c <= C and C % c == 0]
        if cands:
            return cands
    # TODO(synk): for small C not a multiple of 128 (e.g. 40/80-dim mel fronts) a
    # lane-dense re-layout (time-major flatten + pltpu.roll fold of per-channel partial
    # sums) would avoid masked partial-vreg stores; kept as full-C-on-lanes for now.
    return [C]


def _sublane_multiple(dtype):
    """Sublane packing for the dtype: 8 (32-bit), 16 (16-bit), 32 (8-bit)."""
    itemsize = jnp.dtype(dtype).itemsize
    return _SUBLANE * max(1, _F32_BYTES // itemsize)


def _single_pass_kernel(x_ref, o_ref, *, eps):
    # Block: (bb, T, tc) — full time axis resident, per-(batch, channel) stats.
    # Padding rows of a partial trailing batch block only affect their own (masked) rows.
    x = x_ref[...].astype(jnp.float32)
    mean = jnp.mean(x, axis=1, keepdims=True)                 # (bb, 1, tc)
    xc = x - mean
    var = jnp.mean(xc * xc, axis=1, keepdims=True)            # biased variance
    o_ref[...] = (xc * jax.lax.rsqrt(var + eps)).astype(o_ref.dtype)


def _stats_kernel(x_ref, mean_ref, m2_ref, *, eps, total_t, block_t):
    # grid = (B, C // tc, nt); time-chunk axis last, marked "arbitrary".
    # mean_ref: running mean (finalized to the mean).
    # m2_ref: running sum of squared deviations, merged Welford-style per chunk
    #         (finalized to rstd).  Centered per-chunk sums avoid the E[x^2]-mean^2
    #         cancellation of the previous version.
    t = pl.program_id(2)
    last = pl.num_programs(2) - 1

    @pl.when(t == 0)
    def _():
        mean_ref[...] = jnp.zeros_like(mean_ref)
        m2_ref[...] = jnp.zeros_like(m2_ref)

    x = x_ref[...].astype(jnp.float32)                        # (1, block_t, tc)
    n_a = (t * block_t).astype(jnp.float32)                   # elements merged so far

    def merge_chunk(xc, n_b, row_mask=None):
        s_b = jnp.sum(xc, axis=1, keepdims=True)              # (1, 1, tc)
        mu_b = s_b / n_b
        d = xc - mu_b
        if row_mask is not None:
            d = jnp.where(row_mask, d, 0.0)
        m2_b = jnp.sum(d * d, axis=1, keepdims=True)
        n = n_a + n_b
        delta = mu_b - mean_ref[...]
        mean_ref[...] = mean_ref[...] + delta * (n_b / n)
        m2_ref[...] = m2_ref[...] + m2_b + (delta * delta) * (n_a * (n_b / n))

    rem = total_t % block_t
    if rem == 0:
        merge_chunk(x, float(block_t))
    else:
        # Only the last (partial) chunk pays the masking cost; full chunks stay lean.
        @pl.when(t != last)
        def _():
            merge_chunk(x, float(block_t))

        @pl.when(t == last)
        def _():
            row = jax.lax.broadcasted_iota(jnp.int32, x.shape, 1)
            mask = row < rem
            merge_chunk(jnp.where(mask, x, 0.0), float(rem), row_mask=mask)

    @pl.when(t == last)
    def _():
        var = jnp.maximum(m2_ref[...] / total_t, 0.0)
        m2_ref[...] = jax.lax.rsqrt(var + eps)


def _normalize_kernel(x_ref, mean_ref, rstd_ref, o_ref):
    x = x_ref[...].astype(jnp.float32)                        # (1, block_t, tc)
    o_ref[...] = ((x - mean_ref[...]) * rstd_ref[...]).astype(o_ref.dtype)


def instance_norm_1d(x, eps=1e-5, *, max_tile_bytes=None,
                     min_grid_points=_MIN_GRID_POINTS):
    """InstanceNorm1d forward. x: (batch, time, channels) -> same shape/dtype."""
    B, T, C = x.shape
    default_tile, vmem_limit = _budgets()
    if max_tile_bytes is None:
        max_tile_bytes = default_tile

    cands = _channel_tile_candidates(C)
    # Prefer the single-pass path (1 read + 1 write of x) whenever some channel tile lets
    # the full time axis fit the budget; the two-pass path costs ~1.5x the HBM traffic.
    fitting = [c for c in cands if T * c * _F32_BYTES <= max_tile_bytes]

    if fitting:
        # Largest fitting tile that still yields >= ~min_grid_points parallel grid
        # points; otherwise the smallest fitting tile (maximizes points when B*C small).
        tc = None
        for c in fitting:
            if B * (C // c) >= min_grid_points:
                tc = c
                break
        if tc is None:
            tc = fitting[-1]
        nc = C // tc

        # Group batch elements per grid step to amortize the ~0.35us/step overhead, but
        # keep enough parallel points for megacore sharding / pipelining.  bb need not
        # divide B: a cdiv grid + masked stores handle the partial trailing block
        # (stats are per-row, so padding rows are harmless).
        per_instance = T * tc * _F32_BYTES
        max_bb = max(1, max_tile_bytes // per_instance)
        bb = max(1, min(B, max_bb))
        target_points = max(1, min(min_grid_points, B * nc))
        need_rows = -(-target_points // nc)
        if need_rows > 1:
            bb = min(bb, max(1, B // need_rows))

        kernel = functools.partial(_single_pass_kernel, eps=eps)
        return pl.pallas_call(
            kernel,
            out_shape=jax.ShapeDtypeStruct((B, T, C), x.dtype),
            grid_spec=pltpu.PrefetchScalarGridSpec(
                num_scalar_prefetch=0,
                grid=(pl.cdiv(B, bb), nc),
                in_specs=[pl.BlockSpec((bb, T, tc), lambda b, c: (b, 0, c))],
                out_specs=pl.BlockSpec((bb, T, tc), lambda b, c: (b, 0, c)),
            ),
            compiler_params=pltpu.CompilerParams(
                dimension_semantics=("parallel", "parallel"),
                vmem_limit_bytes=vmem_limit,
            ),
        )(x)

    # Long-time-axis path: stats pass (chunked Welford merge), then a normalize pass.
    tc = cands[0]
    nc = C // tc
    pack = _sublane_multiple(x.dtype)
    tt = max(pack, (max_tile_bytes // (tc * _F32_BYTES)) // pack * pack)
    nt = pl.cdiv(T, tt)

    stats_kernel = functools.partial(_stats_kernel, eps=eps, total_t=T, block_t=tt)
    mean, rstd = pl.pallas_call(
        stats_kernel,
        out_shape=(
            jax.ShapeDtypeStruct((B, 1, C), jnp.float32),
            jax.ShapeDtypeStruct((B, 1, C), jnp.float32),
        ),
        grid_spec=pltpu.PrefetchScalarGridSpec(
            num_scalar_prefetch=0,
            grid=(B, nc, nt),
            in_specs=[pl.BlockSpec((1, tt, tc), lambda b, c, t: (b, t, c))],
            out_specs=(
                pl.BlockSpec((1, 1, tc), lambda b, c, t: (b, 0, c)),
                pl.BlockSpec((1, 1, tc), lambda b, c, t: (b, 0, c)),
            ),
        ),
        compiler_params=pltpu.CompilerParams(
            dimension_semantics=("parallel", "parallel", "arbitrary"),
            vmem_limit_bytes=vmem_limit,
        ),
    )(x)

    # TODO(synk): the stats + normalize passes could be fused into a single pallas_call
    # (doubled trailing time axis: accumulate half / normalize half, stats in VMEM
    # scratch) to save a launch and the tiny mean/rstd HBM round trip.
    return pl.pallas_call(
        _normalize_kernel,
        out_shape=jax.ShapeDtypeStruct((B, T, C), x.dtype),
        grid_spec=pltpu.PrefetchScalarGridSpec(
            num_scalar_prefetch=0,
            grid=(B, nc, nt),
            in_specs=[
                pl.BlockSpec((1, tt, tc), lambda b, c, t: (b, t, c)),
                pl.BlockSpec((1, 1, tc), lambda b, c, t: (b, 0, c)),
                pl.BlockSpec((1, 1, tc), lambda b, c, t: (b, 0, c)),
            ],
            out_specs=pl.BlockSpec((1, tt, tc), lambda b, c, t: (b, t, c)),
        ),
        compiler_params=pltpu.CompilerParams(
            dimension_semantics=("parallel", "parallel", "parallel"),
            vmem_limit_bytes=vmem_limit,
        ),
    )(x, mean, rstd)


def _reference(x, eps=1e-5):
    mean = jnp.mean(x, axis=1, keepdims=True)
    var = jnp.mean((x - mean) ** 2, axis=1, keepdims=True)
    return (x - mean) / jnp.sqrt(var + eps)


if __name__ == "__main__":
    # Test 1: small shape, hits the single-pass path.
    key = jax.random.PRNGKey(0)
    B, T, C = 2, 16, 32  # (batch, time, channels)
    x = jax.random.normal(key, (B, T, C), dtype=jnp.float32)
    y = jax.block_until_ready(instance_norm_1d(x, eps=1e-5))
    y_ref = _reference(x, eps=1e-5)
    assert y.shape == x.shape
    assert jnp.allclose(y, y_ref, atol=1e-5, rtol=1e-5), "single-pass mismatch vs reference"

    # Test 2: force the two-pass (chunked Welford) path with a partial trailing time
    # chunk and a large DC offset (stresses the centered-stats merge).
    B2, T2, C2 = 2, 20, 256
    x2 = 0.5 * jax.random.normal(jax.random.PRNGKey(1), (B2, T2, C2), dtype=jnp.float32) + 100.0
    y2 = jax.block_until_ready(instance_norm_1d(x2, eps=1e-5, max_tile_bytes=8 * 1024))
    y2_ref = _reference(x2, eps=1e-5)
    assert y2.shape == x2.shape
    assert jnp.allclose(y2, y2_ref, atol=2e-3, rtol=2e-3), "two-pass mismatch vs reference"

    # Test 3: partial trailing batch block (cdiv batch grouping with bb not dividing B).
    B3, T3, C3 = 3, 16, 128
    x3 = jax.random.normal(jax.random.PRNGKey(2), (B3, T3, C3), dtype=jnp.float32)
    y3 = jax.block_until_ready(
        instance_norm_1d(x3, eps=1e-5, max_tile_bytes=16 * 1024, min_grid_points=1))
    y3_ref = _reference(x3, eps=1e-5)
    assert y3.shape == x3.shape
    assert jnp.allclose(y3, y3_ref, atol=1e-5, rtol=1e-5), "partial-batch mismatch vs reference"

    print("KERNEL_OK")
</pallas_src>

<mosaic_0001>
module attributes {stable_mosaic.version = 11 : i64} {
  func.func @_single_pass_kernel(%arg0: i32, %arg1: i32, %arg2: memref<1x16x32xf32, #tpu.memory_space<vmem>>, %arg3: memref<1x16x32xf32, #tpu.memory_space<vmem>>) attributes {dimension_semantics = [#tpu.dimension_semantics<parallel>, #tpu.dimension_semantics<parallel>], iteration_bounds = array<i64: 2, 1>, scalar_prefetch = 0 : i64, scratch_operands = 0 : i64, tpu.core_type = #tpu.core_type<tc>, window_params = [{transform_indices = @transform_0, window_bounds = array<i64: 1, 16, 32>}, {transform_indices = @transform_1, window_bounds = array<i64: 1, 16, 32>}]} {
    %c0 = arith.constant 0 : index
    %c0_0 = arith.constant 0 : index
    %c0_1 = arith.constant 0 : index
    %0 = vector.load %arg2[%c0, %c0_0, %c0_1] : memref<1x16x32xf32, #tpu.memory_space<vmem>>, vector<1x16x32xf32>
    %cst = arith.constant dense<0.000000e+00> : vector<1x32xf32>
    %1 = vector.multi_reduction <add>, %0, %cst [1] : vector<1x16x32xf32> to vector<1x32xf32>
    %2 = vector.shape_cast %1 : vector<1x32xf32> to vector<1x1x32xf32>
    %cst_2 = arith.constant 1.600000e+01 : f32
    %3 = vector.broadcast %cst_2 : f32 to vector<1x1x32xf32>
    %4 = arith.divf %2, %3 : vector<1x1x32xf32>
    %5 = vector.broadcast %4 : vector<1x1x32xf32> to vector<1x16x32xf32>
    %6 = arith.subf %0, %5 : vector<1x16x32xf32>
    %7 = arith.mulf %6, %6 : vector<1x16x32xf32>
    %cst_3 = arith.constant dense<0.000000e+00> : vector<1x32xf32>
    %8 = vector.multi_reduction <add>, %7, %cst_3 [1] : vector<1x16x32xf32> to vector<1x32xf32>
    %9 = vector.shape_cast %8 : vector<1x32xf32> to vector<1x1x32xf32>
    %cst_4 = arith.constant 1.600000e+01 : f32
    %10 = vector.broadcast %cst_4 : f32 to vector<1x1x32xf32>
    %11 = arith.divf %9, %10 : vector<1x1x32xf32>
    %cst_5 = arith.constant 9.99999974E-6 : f32
    %12 = vector.broadcast %cst_5 : f32 to vector<1x1x32xf32>
    %13 = arith.addf %11, %12 : vector<1x1x32xf32>
    %14 = math.rsqrt %13 : vector<1x1x32xf32>
    %15 = vector.broadcast %14 : vector<1x1x32xf32> to vector<1x16x32xf32>
    %16 = arith.mulf %6, %15 : vector<1x16x32xf32>
    %c0_6 = arith.constant 0 : index
    %c0_7 = arith.constant 0 : index
    %c0_8 = arith.constant 0 : index
    %17 = vector.load %arg3[%c0_6, %c0_7, %c0_8] : memref<1x16x32xf32, #tpu.memory_space<vmem>>, vector<1x16x32xf32>
    tpu.vector_store %arg3[%c0_6, %c0_7, %c0_8], %16 {strides = array<i32>} : memref<1x16x32xf32, #tpu.memory_space<vmem>>, vector<1x16x32xf32>,
    return
  }
  func.func @transform_0(%arg0: i32, %arg1: i32) -> (i32, i32, i32) {
    %c0_i32 = arith.constant 0 : i32
    %c0_i32_0 = arith.constant 0 : i32
    return %arg0, %c0_i32, %arg1 : i32, i32, i32
  }
  func.func @transform_1(%arg0: i32, %arg1: i32) -> (i32, i32, i32) {
    %c0_i32 = arith.constant 0 : i32
    %c0_i32_0 = arith.constant 0 : i32
    return %arg0, %c0_i32, %arg1 : i32, i32, i32
  }
}

</mosaic_0001>

<bundles_post_ra>
// kernel: tpu_custom_call.1
= control target key start
LH: loop header
LB: loop body
LE: loop exit
PB: predicated region body
PF: predicated region fallthrough
CT: control target
= control target key end

     0   :  { %6 = vsyncpa [#allocation3], 0  ;;  %s686_s0 = inlined_call_operand.hbm [shape: f32[2,16,32], index: 0, kind: input, shape index: {}]   ;;  %s687_s1 = inlined_call_operand.hbm [shape: f32[2,16,32], index: 1, kind: output, shape index: {}]  }
   0x1   :  { %8 = vsyncpa [#allocation3 + $0x1], 0 }
   0x2   :  { %9 = vsyncpa [#allocation4], 0 }
   0x3   :  { %11 = vsyncpa [#allocation4 + $0x1], 0  ;;  %s501_s6 = smov 0   ;;  %s503_s7 = smov 0  }
   0x4   :  { %s505_s8 = smov 0   ;;  %s507_s9 = smov 0  }
   0x5   :  { %s509_s10 = smov 0   ;;  %s511_s11 = smov 0  }
   0x6 LB: > { %s286_s12 = sadd.s32 4294967295, %s483_s11   ;;  %s287_s13 = sadd.s32 4294967294, %s483_s11   ;;  %s483_s11 = sphi %s511_s11, %s17_s11   ;;  %s479_s10 = sphi %s509_s10, %s702_s10   ;;  %s475_s9 = sphi %s507_s9, %s701_s9   ;;  %s471_s8 = sphi %s505_s8, %s700_s8   ;;  %s467_s7 = sphi %s503_s7, %s699_s7   ;;  %s463_s6 = sphi %s501_s6, %s698_s6  }
   0x7   : > { %s29_s14 = sadd.s32 1, %s479_s10  ;;  %s38_s15 = sadd.s32 1, %s471_s8 }
   0x8   : > { %p31_p0 = scmp.ge.s32.totalorder %s29_s14, 2  ;;  %p45_p1 = scmp.ne.s32.totalorder %s471_s8, %s467_s7 }
   0x9   : > { %p46_p2 = scmp.eq.s32.totalorder %s483_s11, 0  ;;  %p51_p3 = scmp.ne.s32.totalorder %s467_s7, %s463_s6 }
   0xa   : > { %s704_s14 = smov (%p31_p0, %s29_s14), 0  ;;  %p52_p5 = scmp.eq.s32.totalorder %s286_s12, 0 }
   0xb   : > { %p542_p4 = por %p46_p2, %p45_p1  ;;  %s33_s17 = ssub.s32 %s479_s10, %s704_s14 }
   0xc   : > { %p77_p6 = scmp.eq.s32.totalorder %s286_s12, 1  ;;  %p36_p7 = scmp.eq.s32.totalorder %s33_s17, 0 }
   0xd   : > { %p548_p8 = por %p52_p5, %p51_p3  ;;  %p83_p10 = scmp.eq.s32.totalorder %s287_s13, 1 }
   0xe   : > { %p552_p9 = por %p77_p6, %p45_p1  ;;  %p315_p13 = scmp.lt.s32.totalorder %s483_s11, 2 }
   0xf   : > { %s557_s20 = scalar_select %p36_p7, %s471_s8, %s38_s15  }
  0x10   : > { %s691_s19 = scalar_select %p552_p9, 1, 0 }
  0x11   : > { %p559_p11 = por %p83_p10, %p51_p3  ;;  %s103_s22 = sand.u32 1, %s471_s8  }
  0x12   : > { %s290_s23 = sshll.u32 %s103_s22, 4  ;;  %s301_s24 = sshll.u32 %s479_s10, 8 }
  0x13   : > { %s692_s21 = scalar_select %p559_p11, 1, 0 }
  0x14   : > { %s570_s27 = scalar_lea.hbm %s686_s0, %s301_s24  ;;  %s107_s28 = scalar_lea.vmem [#allocation2], %s290_s23 }
  0x15   : > { %s115_s29 = sshll.u32 %s107_s28, 4  ;;  %p576_p0 = pnand %p315_p13, %p542_p4  ;;  %s572_s29 = int_to_ptr.vmem [resolvable:$true] %s115_s29 }
  0x16   : > { %s581_s2 = scalar_lea.sflag [#allocation3], %s103_s22  ;;  %s371_s3 = scalar_lea.hbm %s570_s27, 256 }
  0x17   : > { %p372_p2 = scmp.ne.s32.totalorder %s570_s27, %s371_s3  ;;  %p373_p3 = pneg %p576_p0 }
  0x18   : > { %s376_s12 = scalar_lea.hbm %s686_s0, 512  ;;  %p377_p4 = scmp.lt.u32.totalorder %s570_s27, %s686_s0 }
  0x19   : > { %p374_p5 = pnand %p373_p3, %p372_p2  ;;  %p378_p7 = scmp.lt.u32.totalorder %s376_s12, %s371_s3 }
  0x1a   : > { %p380_p13 = scmp.lt.u32.totalorder %s371_s3, %s570_s27 }
  0x1b   : > { %p375_p6 = pneg %p374_p5  ;;  %p379_p10 = por %p378_p7, %p377_p4 }
  0x1d   : > { %p381_p12 = por %p380_p13, %p379_p10 }
  0x1f   : > { %p382_p1 = pnand %p381_p12, %p375_p6 }
  0x21   : > { %385 = shalt.err (!%p382_p1)
}
  0x22   : > { %s386_s16 = scalar_lea.vmem %s572_s29, 256  ;;  %s485_s17 = smov [#allocation2]  }
  0x23   : > { %p387_p2 = scmp.ne.s32.totalorder %s572_s29, %s386_s16  ;;  %s391_s22 = sshll.u32 %s485_s17, 4  ;;  %s392_s22 = int_to_ptr.vmem [resolvable:$false] %s391_s22 }
  0x24   : > { %s393_s23 = scalar_lea.vmem %s392_s22, 512  ;;  %p394_p9 = scmp.lt.s32.totalorder %s572_s29, %s392_s22 }
  0x25   : > { %p389_p5 = pnand %p387_p2, %p373_p3  ;;  %p395_p4 = scmp.lt.s32.totalorder %s393_s23, %s386_s16 }
  0x27   : > { %p390_p11 = pneg %p389_p5  ;;  %p396_p7 = por %p395_p4, %p394_p9 }
  0x29   : > { %p397_p10 = pnand %p396_p7, %p390_p11 }
  0x2b   : > { %400 = shalt.err (!%p397_p10)
}
  0x2c   : > { %s486_s24 = smov 128   ;;  %s487_s25 = smov 8  }
  0x2d   : > { %310 = dma.hbm_to_vmem [thread:$0]  (!%p576_p0), %s570_s27, 256, %s572_s29, %s581_s2, %s486_s24, %s486_s24, %s487_s25  }
  0x2e   : > { %p123_p12 = scmp.lt.s32.totalorder %s483_s11, 3  ;;  %p694_p1 = scmp.ge.s32.totalorder %s483_s11, 1 }
  0x30   : > { %p124_p3 = pnand %p694_p1, %p123_p12 }
  0x31   : > { %s613_s26 = sand.u32 (!%p124_p3), 1, %s467_s7  }
  0x32   : > { %127 = sbr.rel (%p124_p3) target bundleno = 127 (0x7f), region = 24  ;;  %s294_s28 = sshll.u32 (!%p124_p3), %s613_s26, 4 }
  0x33   : > { %s130_s3 = scalar_lea.sflag (!%p124_p3), [#allocation3], %s613_s26  ;;  %s133_s4 = scalar_lea.vmem (!%p124_p3), [#allocation2], %s294_s28 }
  0x39   : > { %454 = dma.done.wait (%p548_p8), %s130_s3, 256  }
  0x3a   : > { %456 = vsyncadd (%p548_p8), %s130_s3, 4294967040  ;;  %vm154_vm0 = vcmask 261120   ;;  %v152_v0 = vld [vmem:[%s133_s4] sm:$0xff]  ;;  %v153_v1 = vld [vmem:[%s133_s4 + $0x8] sm:$0xff]  ;;  %s151_s18 = scalar_lea.vmem [#allocation5], %s294_s28  ;;  %s302_s29 = sshll.u32 %s475_s9, 8 }
  0x3b   : > { %v155_v2 = vsel %vm154_vm0, %v152_v0, 0.0  ;;  %v156_v3 = vsel %vm154_vm0, %v153_v1, 0.0  ;;  %s201_s27 = sshll.u32 %s151_s18, 4  ;;  %s635_s5 = scalar_lea.hbm %s687_s1, %s302_s29  ;;  %s630_s27 = int_to_ptr.vmem [resolvable:$true] %s201_s27 }
  0x3c   : > { %v157_v4 = vadd.f32 %v156_v3, %v155_v2  ;;  %s187_s12 = scalar_lea.sflag [#allocation4], %s613_s26  ;;  %s401_s13 = scalar_lea.vmem %s630_s27, 256 }
  0x3d   : > { %p402_p8 = scmp.ne.s32.totalorder %s630_s27, %s401_s13  ;;  %p695_p9 = scmp.ne.s32.totalorder %s691_s19, 0 }
  0x3e   : > { %v158_v5 = vrot.slane %v157_v4, 4  ;;  %s488_s9 = smov [#allocation5]  }
  0x3f   : > { %p403_p11 = pnand %p402_p8, %p695_p9  ;;  %s405_s15 = sshll.u32 %s488_s9, 4  ;;  %s406_s15 = int_to_ptr.vmem [resolvable:$false] %s405_s15 }
  0x40   : > { %v159_v6 = vadd.f32 %v158_v5, %v157_v4  ;;  %s407_s16 = scalar_lea.vmem %s406_s15, 512  ;;  %p408_p6 = scmp.lt.s32.totalorder %s630_s27, %s406_s15 }
  0x41   : > { %p404_p0 = pneg %p403_p11  ;;  %p409_p13 = scmp.lt.s32.totalorder %s407_s16, %s401_s13 }
  0x42   : > { %v160_v7 = vrot.slane %v159_v6, 2 }
  0x43   : > { %p410_p2 = por %p409_p13, %p408_p6 }
  0x44   : > { %v161_v8 = vadd.f32 %v160_v7, %v159_v6 }
  0x45   : > { %p411_p5 = pnand %p410_p2, %p404_p0 }
  0x46   : > { %v162_v9 = vrot.slane %v161_v8, 1 }
  0x48   : > { %v163_v10 = vadd.f32 %v162_v9, %v161_v8 }
  0x4a   : > { %v165_v11 = vmul.f32 0.0625, %v163_v10 }
  0x4c   : > { %v166_v12 = vsub.f32 %v152_v0, %v165_v11  ;;  %v167_v13 = vsub.f32 %v153_v1, %v165_v11 }
  0x4e   : > { %v168_v14 = vmul.f32 %v166_v12, %v166_v12  ;;  %v169_v15 = vmul.f32 %v167_v13, %v167_v13 }
  0x50   : > { %v170_v16 = vsel %vm154_vm0, %v168_v14, 0.0  ;;  %v171_v17 = vsel %vm154_vm0, %v169_v15, 0.0 }
  0x51   : > { %v172_v18 = vadd.f32 %v171_v17, %v170_v16 }
  0x53   : > { %v173_v19 = vrot.slane %v172_v18, 4 }
  0x55   : > { %v174_v20 = vadd.f32 %v173_v19, %v172_v18 }
  0x57   : > { %v175_v21 = vrot.slane %v174_v20, 2 }
  0x59   : > { %v176_v22 = vadd.f32 %v175_v21, %v174_v20 }
  0x5b   : > { %v177_v23 = vrot.slane %v176_v22, 1 }
  0x5d   : > { %v178_v24 = vadd.f32 %v177_v23, %v176_v22 }
  0x5f   : > { %v179_v25 = vmul.f32 0.0625, %v178_v24 }
  0x61   : > { %v180_v26 = vadd.f32 1e-05, %v179_v25 }
  0x63   : > { %369 = vrsqrt.f32 %v180_v26 }
  0x6d   : > { %v370_v27 = vpop.eup %369 }
  0x6e   : > { %v182_v28 = vmul.f32 %v370_v27, %v166_v12  ;;  %v183_v29 = vmul.f32 %v370_v27, %v167_v13 }
  0x70   : > { %184 = vst.msk [vmem:[%s151_s18] sm:$0xff] %vm154_vm0, %v182_v28  ;;  %185 = vst.msk [vmem:[%s151_s18 + $0x8] sm:$0xff] %vm154_vm0, %v183_v29 }
  0x71   : > { %414 = shalt.err (!%p411_p5)
}
  0x72   : > { %s415_s17 = scalar_lea.hbm %s635_s5, 256  ;;  %s419_s24 = scalar_lea.hbm %s687_s1, 512 }
  0x73   : > { %p416_p4 = scmp.ne.s32.totalorder %s635_s5, %s415_s17  ;;  %p420_p12 = scmp.lt.u32.totalorder %s635_s5, %s687_s1 }
  0x74   : > { %p421_p1 = scmp.lt.u32.totalorder %s419_s24, %s415_s17  ;;  %p423_p8 = scmp.lt.u32.totalorder %s415_s17, %s635_s5 }
  0x75   : > { %p417_p7 = pnand %p416_p4, %p695_p9 }
  0x76   : > { %p422_p3 = por %p421_p1, %p420_p12 }
  0x77   : > { %p418_p10 = pneg %p417_p7 }
  0x78   : > { %p424_p11 = por %p423_p8, %p422_p3 }
  0x7a   : > { %p425_p0 = pnand %p424_p11, %p418_p10 }
  0x7c   : > { %428 = shalt.err (!%p425_p0)
}
  0x7d   : > { %s489_s3 = smov 128   ;;  %s490_s4 = smov 8  }
  0x7e   : > { %305 = dma.vmem_to_hbm [thread:$0]  (%p695_p9), %s630_s27, 256, %s635_s5, %s187_s12, %s489_s3, %s489_s3, %s490_s4  }
  0x7f PF: > { %s216_s18 = sand.u32 1, %s463_s6   ;;  %p696_p6 = scmp.ne.s32.totalorder %s692_s21, 0 }
  0x80   : > { %p697_p13 = scmp.ge.s32.totalorder %s483_s11, 2  ;;  %s217_s29 = scalar_lea.sflag [#allocation4], %s216_s18 }
  0x82   : > { %p312_p2 = pnand %p697_p13, %p696_p6 }
  0x84   : > { %458 = dma.done.wait (!%p312_p2), %s217_s29, 256  }
  0x85   : > { %460 = vsyncadd (!%p312_p2), %s217_s29, 4294967040  ;;  %s17_s11 = sadd.s32 1, %s483_s11   ;;  %s698_s6 = smov %s467_s7 }
  0x86   : > { %p14_p5 = scmp.ge.s32.totalorder %s17_s11, 4   ;;  %s699_s7 = smov %s471_s8 }
  0x87   : > { %s700_s8 = smov %s557_s20  ;;  %s701_s9 = smov %s479_s10 }
  0x88   : > { %s702_s10 = smov %s704_s14  ;;  %16 = sbr.rel (!%p14_p5) target bundleno = 6 (0x6), region = 69 }
  0x8f   :  { %222 = vsyncpa [#allocation3], 1 }
  0x90   :  { %224 = vsyncpa [#allocation3 + $0x1], 1 }
  0x91   :  { %225 = vsyncpa [#allocation4], 1 }
  0x92   :  { %227 = vsyncpa [#allocation4 + $0x1], 1 }

</bundles_post_ra>
